<compile_context>
chip_gen: v7x
topology: tpu7x:2x2x1
jax: 0.10.0
libtpu: 0.0.40
codegen_flags: <defaults>
</compile_context>

<pallas_src>
import functools

import jax
import jax.numpy as jnp
from jax.experimental import pallas as pl
from jax.experimental.pallas import tpu as pltpu


def _conv1x1_relu_kernel(x_ref, w_ref, b_ref, o_ref):
    # x_ref: (1, C_in, t_hw) in x dtype   w_ref: (tn, C_in) bf16
    # b_ref: (tn, 1) f32                  o_ref: (1, tn, t_hw) in x dtype
    x = x_ref[0].astype(jnp.bfloat16)                      # cast hides under MXU
    y = jnp.dot(w_ref[...], x, preferred_element_type=jnp.float32)
    y = y + b_ref[...]                                     # bias broadcast over pixels
    o_ref[0] = jnp.maximum(y, 0.0).astype(o_ref.dtype)     # fused ReLU + store


def prepare_params(weight, bias):
    """One-time parameter prep (hoisted out of the per-call path).

    weight: (C_out, C_in, 1, 1) f32  ->  (C_out, C_in) bf16
    bias:   (C_out,)                 ->  (C_out, 1) f32
    """
    c_out, c_in = weight.shape[0], weight.shape[1]
    w2 = weight.reshape(c_out, c_in).astype(jnp.bfloat16)
    b2 = bias.astype(jnp.float32).reshape(c_out, 1)
    return w2, b2


@functools.partial(jax.jit, static_argnames=("t_hw", "tn"))
def transform_module_forward(x_nchw, w2, b2, *, t_hw=512, tn=512):
    """Equivalent of Transform_Module.forward.

    x_nchw: (N, C_in, H, W)
    w2:     (C_out, C_in) bf16   (from prepare_params)
    b2:     (C_out, 1)   f32     (from prepare_params)
    returns (N, C_out, H, W) with x's dtype.
    """
    N, C_in, H, W = x_nchw.shape
    C_out = w2.shape[0]
    HW = H * W

    # If a dim fits in one tile, take the full dim (no divisibility constraint
    # then); otherwise keep lane/sublane-aligned tile sizes and let Pallas
    # boundary blocks mask the non-dividing tail.
    t_hw = HW if HW <= t_hw else t_hw
    tn = C_out if C_out <= tn else tn
    if HW > t_hw:
        assert t_hw % 128 == 0, "pixel tile must be lane-aligned when tiling HW"
    if C_out > tn:
        assert tn % 8 == 0, "channel tile must be sublane-aligned when tiling C_out"

    x3 = x_nchw.reshape(N, C_in, HW)                       # metadata-only view

    grid = (N, pl.cdiv(C_out, tn), pl.cdiv(HW, t_hw))      # pixel axis innermost

    y = pl.pallas_call(
        _conv1x1_relu_kernel,
        out_shape=jax.ShapeDtypeStruct((N, C_out, HW), x_nchw.dtype),
        grid_spec=pltpu.PrefetchScalarGridSpec(
            num_scalar_prefetch=0,
            grid=grid,
            in_specs=[
                # x[n] slab: index invariant in i -> not re-fetched across the
                # Cout sweep when HW fits a single pixel tile.
                pl.BlockSpec((1, C_in, t_hw), lambda n, i, j: (n, 0, j)),
                # W row-block: index invariant along the innermost (pixel) axis
                # -> stays VMEM-resident across all pixel tiles.
                pl.BlockSpec((tn, C_in), lambda n, i, j: (i, 0)),
                pl.BlockSpec((tn, 1), lambda n, i, j: (i, 0)),
            ],
            out_specs=pl.BlockSpec((1, tn, t_hw), lambda n, i, j: (n, i, j)),
        ),
        compiler_params=pltpu.CompilerParams(
            dimension_semantics=("parallel", "parallel", "parallel"),
            vmem_limit_bytes=48 * 1024 * 1024,
        ),
    )(x3, w2, b2)

    return y.reshape(N, C_out, H, W)


def make_params(input_dim):
    """Deterministic init matching Transform_Module.__init__:
    identity (eye) conv weight, zero bias."""
    weight = jnp.eye(input_dim, dtype=jnp.float32).reshape(
        input_dim, input_dim, 1, 1
    )
    bias = jnp.zeros((input_dim,), dtype=jnp.float32)
    return weight, bias


def _reference(x, weight, bias):
    """Pure-JAX reference with the same bf16 operand rounding + f32 accumulation."""
    c_out, c_in = weight.shape[0], weight.shape[1]
    xb = x.astype(jnp.bfloat16).astype(jnp.float32)
    wb = weight.reshape(c_out, c_in).astype(jnp.bfloat16).astype(jnp.float32)
    y = jnp.einsum("oc,nchw->nohw", wb, xb,
                   precision=jax.lax.Precision.HIGHEST)
    y = y + bias[None, :, None, None]
    return jnp.maximum(y, 0.0)


if __name__ == "__main__":
    key = jax.random.PRNGKey(0)
    kx, kw, kb, kx2, kx3, kw3, kb3 = jax.random.split(key, 7)

    # --- Test 1: module-faithful init (identity weight, zero bias) -----------
    N, C, H, W = 2, 128, 16, 16
    x = jax.random.normal(kx, (N, C, H, W), dtype=jnp.float32)
    weight_id, bias_id = make_params(C)
    w2, b2 = prepare_params(weight_id, bias_id)
    y_id = jax.block_until_ready(transform_module_forward(x, w2, b2))
    assert y_id.shape == (N, C, H, W)
    assert jnp.allclose(y_id, _reference(x, weight_id, bias_id),
                        atol=1e-3, rtol=1e-3)

    # --- Test 2: random conv params, non-tile-aligned channels & spatial -----
    N2, C2, H2, W2 = 2, 64, 10, 10
    x2 = jax.random.normal(kx2, (N2, C2, H2, W2), dtype=jnp.float32)
    w_r = 0.05 * jax.random.normal(kw, (C2, C2, 1, 1), dtype=jnp.float32)
    b_r = 0.10 * jax.random.normal(kb, (C2,), dtype=jnp.float32)
    y2 = jax.block_until_ready(
        transform_module_forward(x2, *prepare_params(w_r, b_r)))
    assert y2.shape == (N2, C2, H2, W2)
    assert jnp.allclose(y2, _reference(x2, w_r, b_r), atol=2e-3, rtol=2e-3)

    # --- Test 3: pixel-tiled path with a non-dividing HW (boundary blocks) ---
    N3, C3, H3, W3 = 1, 8, 20, 20       # HW = 400, t_hw = 128 -> 4 pixel blocks
    x3 = jax.random.normal(kx3, (N3, C3, H3, W3), dtype=jnp.float32)
    w3 = 0.05 * jax.random.normal(kw3, (C3, C3, 1, 1), dtype=jnp.float32)
    b3 = 0.10 * jax.random.normal(kb3, (C3,), dtype=jnp.float32)
    y3 = jax.block_until_ready(
        transform_module_forward(x3, *prepare_params(w3, b3), t_hw=128, tn=8))
    assert y3.shape == (N3, C3, H3, W3)
    assert jnp.allclose(y3, _reference(x3, w3, b3), atol=2e-3, rtol=2e-3)

    print("KERNEL_OK")
</pallas_src>

<mosaic_0001>
module attributes {stable_mosaic.version = 11 : i64} {
  func.func @_conv1x1_relu_kernel(%arg0: i32, %arg1: i32, %arg2: i32, %arg3: memref<1x128x256xf32, #tpu.memory_space<vmem>>, %arg4: memref<128x128xbf16, #tpu.memory_space<vmem>>, %arg5: memref<128x1xf32, #tpu.memory_space<vmem>>, %arg6: memref<1x128x256xf32, #tpu.memory_space<vmem>>) attributes {dimension_semantics = [#tpu.dimension_semantics<parallel>, #tpu.dimension_semantics<parallel>, #tpu.dimension_semantics<parallel>], iteration_bounds = array<i64: 2, 1, 1>, scalar_prefetch = 0 : i64, scratch_operands = 0 : i64, tpu.core_type = #tpu.core_type<tc>, window_params = [{transform_indices = @transform_0, window_bounds = array<i64: 1, 128, 256>}, {transform_indices = @transform_1, window_bounds = array<i64: 128, 128>}, {transform_indices = @transform_2, window_bounds = array<i64: 128, 1>}, {transform_indices = @transform_3, window_bounds = array<i64: 1, 128, 256>}]} {
    %c0 = arith.constant 0 : index
    %c0_0 = arith.constant 0 : index
    %c0_1 = arith.constant 0 : index
    %0 = vector.load %arg3[%c0, %c0_0, %c0_1] : memref<1x128x256xf32, #tpu.memory_space<vmem>>, vector<1x128x256xf32>
    %1 = vector.shape_cast %0 : vector<1x128x256xf32> to vector<128x256xf32>
    %2 = arith.truncf %1 : vector<128x256xf32> to vector<128x256xbf16>
    %c0_2 = arith.constant 0 : index
    %c0_3 = arith.constant 0 : index
    %3 = vector.load %arg4[%c0_2, %c0_3] : memref<128x128xbf16, #tpu.memory_space<vmem>>, vector<128x128xbf16>
    %cst = arith.constant dense<0.000000e+00> : vector<128x256xf32>
    %4 = tpu.matmul %3, %2, %cst {dimension_numbers = #tpu.dot_dimension_numbers<[1], [0], [0], [1], [0, 0, 1, 1], [], []>} : vector<128x128xbf16>, vector<128x256xbf16>, vector<128x256xf32> -> vector<128x256xf32>
    %c0_4 = arith.constant 0 : index
    %c0_5 = arith.constant 0 : index
    %5 = vector.load %arg5[%c0_4, %c0_5] : memref<128x1xf32, #tpu.memory_space<vmem>>, vector<128x1xf32>
    %6 = vector.broadcast %5 : vector<128x1xf32> to vector<128x256xf32>
    %7 = arith.addf %4, %6 : vector<128x256xf32>
    %cst_6 = arith.constant 0.000000e+00 : f32
    %8 = vector.broadcast %cst_6 : f32 to vector<128x256xf32>
    %9 = arith.maximumf %7, %8 : vector<128x256xf32>
    %c0_7 = arith.constant 0 : index
    %c0_8 = arith.constant 0 : index
    %c0_9 = arith.constant 0 : index
    %10 = vector.load %arg6[%c0_7, %c0_8, %c0_9] : memref<1x128x256xf32, #tpu.memory_space<vmem>>, vector<1x128x256xf32>
    %11 = vector.shape_cast %10 : vector<1x128x256xf32> to vector<128x256xf32>
    %12 = vector.shape_cast %9 : vector<128x256xf32> to vector<1x128x256xf32>
    tpu.vector_store %arg6[%c0_7, %c0_8, %c0_9], %12 {strides = array<i32>} : memref<1x128x256xf32, #tpu.memory_space<vmem>>, vector<1x128x256xf32>,
    return
  }
  func.func @transform_0(%arg0: i32, %arg1: i32, %arg2: i32) -> (i32, i32, i32) {
    %c0_i32 = arith.constant 0 : i32
    %c0_i32_0 = arith.constant 0 : i32
    return %arg0, %c0_i32, %arg2 : i32, i32, i32
  }
  func.func @transform_1(%arg0: i32, %arg1: i32, %arg2: i32) -> (i32, i32) {
    %c0_i32 = arith.constant 0 : i32
    %c0_i32_0 = arith.constant 0 : i32
    return %arg1, %c0_i32 : i32, i32
  }
  func.func @transform_2(%arg0: i32, %arg1: i32, %arg2: i32) -> (i32, i32) {
    %c0_i32 = arith.constant 0 : i32
    %c0_i32_0 = arith.constant 0 : i32
    return %arg1, %c0_i32 : i32, i32
  }
  func.func @transform_3(%arg0: i32, %arg1: i32, %arg2: i32) -> (i32, i32, i32) {
    %c0_i32 = arith.constant 0 : i32
    return %arg0, %arg1, %arg2 : i32, i32, i32
  }
}

</mosaic_0001>

<bundles_post_ra>
// kernel: transform_module_forward.1
= control target key start
LH: loop header
LB: loop body
LE: loop exit
PB: predicated region body
PF: predicated region fallthrough
CT: control target
= control target key end

     0   :  { %s918_s12 = smov 0   ;;  %s920_s13 = smov 0   ;;  %s1124_s0 = inlined_call_operand.vmem [shape: f32[2,128,256], index: 0, kind: input, shape index: {}]   ;;  %s1125_s1 = inlined_call_operand.vmem [shape: bf16[128,128], index: 1, kind: input, shape index: {}]   ;;  %s1126_s2 = inlined_call_operand.vmem [shape: f32[128,1], index: 2, kind: input, shape index: {}]   ;;  %s1127_s3 = inlined_call_operand.vmem [shape: f32[2,128,256], index: 3, kind: output, shape index: {}]  }
   0x1   :  { %s922_s14 = smov 0  }
   0x2 LB: > { %s32_s15 = sadd.s32 1, %s891_s13  ;;  %p805_p0 = scmp.ge.s32.totalorder %s895_s14, 1  ;;  %s895_s14 = sphi %s922_s14, %s13_s14   ;;  %s891_s13 = sphi %s920_s13, %s1129_s13   ;;  %s887_s12 = sphi %s918_s12, %s1128_s12  }
   0x3   : > { %p34_p1 = scmp.ge.s32.totalorder %s32_s15, 2  ;;  %p189_p2 = scmp.lt.s32.totalorder %s895_s14, 3 }
   0x5   : > { %s1131_s15 = smov (%p34_p1, %s32_s15), 0  ;;  %p190_p3 = pnand %p805_p0, %p189_p2 }
   0x6   : > { %p237_p4 = scmp.lt.s32.totalorder (!%p190_p3), %s887_s12, 1  ;;  %v897_v0 = vmov (!%p190_p3), 0   ;;  %v341_v30 = vld [vmem:[%s1126_s2 + $0x10] sm:$0xff] (!%p190_p3)  ;;  %v339_v31 = vld [vmem:[%s1126_s2] sm:$0xff] (!%p190_p3)  ;;  %v342_v34 = vld [vmem:[%s1126_s2 + $0x18] sm:$0xff] (!%p190_p3) }
   0x7   : > { %193 = sbr.rel (%p190_p3) target bundleno = 296 (0x128), region = 32  ;;  %515 = vmatprep.mubr.bf16.mxu0 (!%p190_p3), %v897_v0  ;;  %555 = vmatprep.mubr.bf16.mxu1 (!%p190_p3), %v897_v0  ;;  %v340_v35 = vld [vmem:[%s1126_s2 + $0x8] sm:$0xff] (!%p190_p3)  ;;  %v343_v43 = vld [vmem:[%s1126_s2 + $0x20] sm:$0xff] (!%p190_p3)  ;;  %v346_v50 = vld [vmem:[%s1126_s2 + $0x38] sm:$0xff] (!%p190_p3) }
   0x8   : > { %864 = vset.pattern.permute.xlu1 (!%p190_p3), %v897_v0  ;;  %863 = vset.pattern.permute.xlu0 (!%p190_p3), %v897_v0  ;;  %v344_v42 = vld [vmem:[%s1126_s2 + $0x28] sm:$0xff] (!%p190_p3)  ;;  %v345_v51 = vld [vmem:[%s1126_s2 + $0x30] sm:$0xff] (!%p190_p3)  ;;  %v347_v57 = vld [vmem:[%s1126_s2 + $0x40] sm:$0xff] (!%p190_p3) }
   0x9   : > { %367 = vperm.xlu1 (!%p190_p3), %864, %v341_v30   ;;  %357 = vperm.xlu0 (!%p190_p3), %863, %v339_v31   ;;  %v348_v56 = vld [vmem:[%s1126_s2 + $0x48] sm:$0xff] (!%p190_p3)  ;;  %v865_v59 = vld [vmem:[%s1125_s1] sm:$0xff] (!%p190_p3)   ;;  %v350_v61 = vld [vmem:[%s1126_s2 + $0x58] sm:$0xff] (!%p190_p3) }
   0xa   : > { %v866_v60 = vld [vmem:[%s1125_s1 + $0x20] sm:$0xff] (!%p190_p3)   ;;  %v349_v62 = vld [vmem:[%s1126_s2 + $0x50] sm:$0xff] (!%p190_p3)  ;;  %v352_v63 = vld [vmem:[%s1126_s2 + $0x68] sm:$0xff] (!%p190_p3) }
   0xd   : > { %372 = vperm.xlu1 (!%p190_p3), %864, %v342_v34   ;;  %362 = vperm.xlu0 (!%p190_p3), %863, %v340_v35  }
   0xe   : > { %s1133_s12 = smov (!%p237_p4, %s887_s12), 1 }
   0xf   : > { %s820_s16 = sshll.u32 %s1133_s12, 8 }
  0x10   : > { %s948_s19 = scalar_lea.vmem %s1124_s0, %s820_s16  ;;  %s1073_s26 = scalar_lea.vmem %s1127_s3, %s820_s16 }
  0x11   : > { %v276_v1 = vld [vmem:[%s948_s19 + $0x8] sm:$0xff]  ;;  %v278_v2 = vld [vmem:[%s948_s19 + $0x18] sm:$0xff]  ;;  %v275_v3 = vld [vmem:[%s948_s19] sm:$0xff]  ;;  %382 = vperm.xlu1 %864, %v344_v42   ;;  %377 = vperm.xlu0 %863, %v343_v43  }
  0x12   : > { %v308_v4 = vpack.c.bf16 %v278_v2, %v276_v1  ;;  %v277_v5 = vld [vmem:[%s948_s19 + $0x10] sm:$0xff]  ;;  %v280_v6 = vld [vmem:[%s948_s19 + $0x28] sm:$0xff]  ;;  %v282_v7 = vld [vmem:[%s948_s19 + $0x38] sm:$0xff] }
  0x13   : > { %v307_v8 = vpack.c.bf16 %v277_v5, %v275_v3  ;;  %v310_v9 = vpack.c.bf16 %v282_v7, %v280_v6  ;;  %v279_v10 = vld [vmem:[%s948_s19 + $0x20] sm:$0xff]  ;;  %v281_v11 = vld [vmem:[%s948_s19 + $0x30] sm:$0xff]  ;;  %v284_v12 = vld [vmem:[%s948_s19 + $0x48] sm:$0xff] }
  0x14   : > { %483 = vmatprep.subr.bf16.mxu0 %v308_v4  ;;  %822 = vmatprep.subr.bf16.mxu1 %v308_v4  ;;  %v286_v13 = vld [vmem:[%s948_s19 + $0x58] sm:$0xff]  ;;  %v309_v14 = vpack.c.bf16 %v281_v11, %v279_v10  ;;  %v283_v16 = vld [vmem:[%s948_s19 + $0x40] sm:$0xff]  ;;  %v285_v17 = vld [vmem:[%s948_s19 + $0x50] sm:$0xff] }
  0x15   : > { %484 = vmatpush1.bf16.msra.mxu0 %v307_v8  ;;  %830 = vmatpush1.bf16.msra.mxu1 %v307_v8  ;;  %v312_v15 = vpack.c.bf16 %v286_v13, %v284_v12  ;;  %v288_v18 = vld [vmem:[%s948_s19 + $0x68] sm:$0xff]  ;;  %v290_v19 = vld [vmem:[%s948_s19 + $0x78] sm:$0xff]  ;;  %v311_v20 = vpack.c.bf16 %v285_v17, %v283_v16  ;;  %v287_v22 = vld [vmem:[%s948_s19 + $0x60] sm:$0xff] }
  0x16   : > { %485 = vmatprep.subr.bf16.mxu0 %v310_v9  ;;  %823 = vmatprep.subr.bf16.mxu1 %v310_v9  ;;  %v314_v21 = vpack.c.bf16 %v290_v19, %v288_v18  ;;  %v289_v23 = vld [vmem:[%s948_s19 + $0x70] sm:$0xff]  ;;  %v292_v24 = vld [vmem:[%s948_s19 + $0x88] sm:$0xff]  ;;  %v294_v25 = vld [vmem:[%s948_s19 + $0x98] sm:$0xff] }
  0x17   : > { %v313_v26 = vpack.c.bf16 %v289_v23, %v287_v22  ;;  %v291_v27 = vld [vmem:[%s948_s19 + $0x80] sm:$0xff]  ;;  %v316_v28 = vpack.c.bf16 %v294_v25, %v292_v24  ;;  %v293_v29 = vld [vmem:[%s948_s19 + $0x90] sm:$0xff]  ;;  %v296_v32 = vld [vmem:[%s948_s19 + $0xa8] sm:$0xff]  ;;  %392 = vperm.xlu1 %864, %v346_v50   ;;  %387 = vperm.xlu0 %863, %v345_v51  }
  0x18   : > { %v298_v33 = vld [vmem:[%s948_s19 + $0xb8] sm:$0xff]  ;;  %v315_v36 = vpack.c.bf16 %v293_v29, %v291_v27  ;;  %v295_v38 = vld [vmem:[%s948_s19 + $0xa0] sm:$0xff]  ;;  %v297_v39 = vld [vmem:[%s948_s19 + $0xb0] sm:$0xff] }
  0x19   : > { %486 = vmatpush1.bf16.msra.mxu0 %v309_v14  ;;  %831 = vmatpush1.bf16.msra.mxu1 %v309_v14  ;;  %v318_v37 = vpack.c.bf16 %v298_v33, %v296_v32  ;;  %v300_v40 = vld [vmem:[%s948_s19 + $0xc8] sm:$0xff]  ;;  %v302_v41 = vld [vmem:[%s948_s19 + $0xd8] sm:$0xff]  ;;  %v317_v44 = vpack.c.bf16 %v297_v39, %v295_v38  ;;  %v299_v46 = vld [vmem:[%s948_s19 + $0xc0] sm:$0xff] }
  0x1a   : > { %487 = vmatprep.subr.bf16.mxu0 %v312_v15  ;;  %824 = vmatprep.subr.bf16.mxu1 %v312_v15  ;;  %v320_v45 = vpack.c.bf16 %v302_v41, %v300_v40  ;;  %v301_v47 = vld [vmem:[%s948_s19 + $0xd0] sm:$0xff]  ;;  %v304_v48 = vld [vmem:[%s948_s19 + $0xe8] sm:$0xff]  ;;  %v306_v49 = vld [vmem:[%s948_s19 + $0xf8] sm:$0xff] }
  0x1b   : > { %v319_v52 = vpack.c.bf16 %v301_v47, %v299_v46  ;;  %v322_v53 = vpack.c.bf16 %v306_v49, %v304_v48  ;;  %v303_v54 = vld [vmem:[%s948_s19 + $0xe0] sm:$0xff]  ;;  %v305_v55 = vld [vmem:[%s948_s19 + $0xf0] sm:$0xff]  ;;  %402 = vperm.xlu1 %864, %v348_v56   ;;  %397 = vperm.xlu0 %863, %v347_v57   ;;  %v867_v2 = vld [vmem:[%s1125_s1 + $0x8] sm:$0xff]  }
  0x1c   : > { %v321_v58 = vpack.c.bf16 %v305_v55, %v303_v54  ;;  %v351_v1 = vld [vmem:[%s1126_s2 + $0x60] sm:$0xff]  ;;  %v868_v3 = vld [vmem:[%s1125_s1 + $0x28] sm:$0xff]   ;;  %v354_v4 = vld [vmem:[%s1126_s2 + $0x78] sm:$0xff] }
  0x1d   : > { %488 = vmatpush1.bf16.msra.mxu0 %v311_v20  ;;  %832 = vmatpush1.bf16.msra.mxu1 %v311_v20  ;;  %v353_v5 = vld [vmem:[%s1126_s2 + $0x70] sm:$0xff]  ;;  %v871_v8 = vld [vmem:[%s1125_s1 + $0x18] sm:$0xff]  }
  0x1e   : > { %489 = vmatprep.subr.bf16.mxu0 %v314_v21  ;;  %825 = vmatprep.subr.bf16.mxu1 %v314_v21  ;;  %v869_v6 = vld [vmem:[%s1125_s1 + $0x10] sm:$0xff]   ;;  %v872_v9 = vld [vmem:[%s1125_s1 + $0x38] sm:$0xff]  }
  0x1f   : > { %412 = vperm.xlu1 %864, %v350_v61   ;;  %407 = vperm.xlu0 %863, %v349_v62   ;;  %v870_v7 = vld [vmem:[%s1125_s1 + $0x30] sm:$0xff]  }
  0x21   : > { %490 = vmatpush1.bf16.msra.mxu0 %v313_v26  ;;  %833 = vmatpush1.bf16.msra.mxu1 %v313_v26 }
  0x22   : > { %491 = vmatprep.subr.bf16.mxu0 %v316_v28  ;;  %826 = vmatprep.subr.bf16.mxu1 %v316_v28 }
  0x23   : > { %422 = vperm.xlu1 %864, %v352_v63   ;;  %417 = vperm.xlu0 %863, %v351_v1  }
  0x25   : > { %492 = vmatpush1.bf16.msra.mxu0 %v315_v36  ;;  %834 = vmatpush1.bf16.msra.mxu1 %v315_v36 }
  0x26   : > { %493 = vmatprep.subr.bf16.mxu0 %v318_v37  ;;  %827 = vmatprep.subr.bf16.mxu1 %v318_v37 }
  0x27   : > { %432 = vperm.xlu1 %864, %v354_v4   ;;  %427 = vperm.xlu0 %863, %v353_v5  }
  0x29   : > { %494 = vmatpush1.bf16.msra.mxu0 %v317_v44  ;;  %835 = vmatpush1.bf16.msra.mxu1 %v317_v44 }
  0x2a   : > { %495 = vmatprep.subr.bf16.mxu0 %v320_v45  ;;  %828 = vmatprep.subr.bf16.mxu1 %v320_v45 }
  0x2d   : > { %496 = vmatpush1.bf16.msra.mxu0 %v319_v52  ;;  %836 = vmatpush1.bf16.msra.mxu1 %v319_v52 }
  0x2e   : > { %497 = vmatprep.subr.bf16.mxu0 %v322_v53  ;;  %829 = vmatprep.subr.bf16.mxu1 %v322_v53 }
  0x31   : > { %498 = vmatpush1.bf16.msra.mxu0 %v321_v58  ;;  %837 = vmatpush1.bf16.msra.mxu1 %v321_v58 }
  0x34   : > { %516 = vmatmul.mubr.bf16.vlgmr.msra.gmra.mrb[0].mxu0 %v865_v59  ;;  %556 = vmatmul.mubr.bf16.vlgmr.msra.gmra.mrb[0].mxu1 %v866_v60 }
  0x35   : > { %525 = vmatprep.mubr.bf16.mxu0 %v897_v0  ;;  %565 = vmatprep.mubr.bf16.mxu1 %v897_v0 }
  0x3c   : > { %526 = vmatmul.mubr.bf16.gmra.mrb[4].mxu0 %v867_v2  ;;  %566 = vmatmul.mubr.bf16.gmra.mrb[4].mxu1 %v868_v3 }
  0x3d   : > { %535 = vmatprep.mubr.bf16.mxu0 %v897_v0  ;;  %575 = vmatprep.mubr.bf16.mxu1 %v897_v0 }
  0x44   : > { %536 = vmatmul.mubr.bf16.gmra.mrb[8].mxu0 %v869_v6  ;;  %576 = vmatmul.mubr.bf16.gmra.mrb[8].mxu1 %v870_v7 }
  0x45   : > { %545 = vmatprep.mubr.bf16.mxu0 %v897_v0  ;;  %585 = vmatprep.mubr.bf16.mxu1 %v897_v0 }
  0x4c   : > { %546 = vmatmul.mubr.bf16.gmra.mrb[12].mxu0 %v871_v8  ;;  %586 = vmatmul.mubr.bf16.gmra.mrb[12].mxu1 %v872_v9 }
  0x88   : > { %v368_v10 = vpop.permute.xlu1 %367  ;;  %v358_v11 = vpop.permute.xlu0 %357 }
  0x8c   : > { %v373_v12 = vpop.permute.xlu1 %372  ;;  %v363_v13 = vpop.permute.xlu0 %362 }
  0x90   : > { %v1060_v14 = vpop.permute.xlu1 %382  ;;  %v1062_v15 = vpop.permute.xlu0 %377 }
  0x96   : > { %v1064_v0 = vpop.permute.xlu1 %392  ;;  %v1066_v16 = vpop.permute.xlu0 %387 }
  0x9a   : > { %v403_v17 = vpop.permute.xlu1 %402  ;;  %v398_v18 = vpop.permute.xlu0 %397 }
  0x9e   : > { %v413_v43 = vpop.permute.xlu1 %412  ;;  %v408_v44 = vpop.permute.xlu0 %407 }
  0xa2   : > { %v423_v6 = vpop.permute.xlu1 %422  ;;  %v418_v7 = vpop.permute.xlu0 %417 }
 0x107   : > { %v517_v19 = vpop.f32.mrb[0].mxu0  ;;  %v557_v20 = vpop.f32.mrb[0].mxu1 }
 0x108   : > { %v518_v21 = vadd.f32 %v517_v19, %v358_v11  ;;  %v558_v22 = vadd.f32 %v557_v20, %v398_v18  ;;  %v519_v23 = vpop.f32.mrb[1].mxu0  ;;  %v559_v24 = vpop.f32.mrb[1].mxu1 }
 0x109   : > { %v520_v25 = vadd.f32 %v519_v23, %v358_v11  ;;  %v560_v26 = vadd.f32 %v559_v24, %v398_v18  ;;  %v521_v27 = vpop.f32.mrb[2].mxu0  ;;  %v561_v28 = vpop.f32.mrb[2].mxu1 }
 0x10a   : > { %v596_v29 = vmax.f32 %v518_v21, 0.0  ;;  %v612_v30 = vmax.f32 %v558_v22, 0.0  ;;  %v522_v31 = vadd.f32 %v521_v27, %v363_v13  ;;  %v562_v32 = vadd.f32 %v561_v28, %v403_v17  ;;  %v523_v33 = vpop.f32.mrb[3].mxu0  ;;  %v563_v34 = vpop.f32.mrb[3].mxu1 }
 0x10b   : > { %v597_v35 = vmax.f32 %v520_v25, 0.0  ;;  %v613_v36 = vmax.f32 %v560_v26, 0.0  ;;  %v524_v37 = vadd.f32 %v523_v33, %v363_v13  ;;  %v564_v38 = vadd.f32 %v563_v34, %v403_v17  ;;  %v433_v34 = vpop.permute.xlu1 %432 }
 0x10c   : > { %628 = vst [vmem:[%s1073_s26] sm:$0xff] %v596_v29  ;;  %644 = vst [vmem:[%s1073_s26 + $0x80] sm:$0xff] %v612_v30  ;;  %v598_v39 = vmax.f32 %v522_v31, 0.0  ;;  %v614_v40 = vmax.f32 %v562_v32, 0.0 }
 0x10d   : > { %629 = vst [vmem:[%s1073_s26 + $0x8] sm:$0xff] %v597_v35  ;;  %645 = vst [vmem:[%s1073_s26 + $0x88] sm:$0xff] %v613_v36  ;;  %v599_v41 = vmax.f32 %v524_v37, 0.0  ;;  %v615_v42 = vmax.f32 %v564_v38, 0.0  ;;  %v428_v35 = vpop.permute.xlu0 %427 }
 0x10e   : > { %630 = vst [vmem:[%s1073_s26 + $0x10] sm:$0xff] %v598_v39  ;;  %646 = vst [vmem:[%s1073_s26 + $0x90] sm:$0xff] %v614_v40 }
 0x10f   : > { %631 = vst [vmem:[%s1073_s26 + $0x18] sm:$0xff] %v599_v41  ;;  %647 = vst [vmem:[%s1073_s26 + $0x98] sm:$0xff] %v615_v42  ;;  %v527_v45 = vpop.f32.mrb[4].mxu0  ;;  %v567_v46 = vpop.f32.mrb[4].mxu1 }
 0x110   : > { %v528_v47 = vadd.f32 %v527_v45, %v368_v10  ;;  %v568_v48 = vadd.f32 %v567_v46, %v408_v44  ;;  %v529_v49 = vpop.f32.mrb[5].mxu0  ;;  %v569_v50 = vpop.f32.mrb[5].mxu1 }
 0x111   : > { %v530_v51 = vadd.f32 %v529_v49, %v368_v10  ;;  %v570_v52 = vadd.f32 %v569_v50, %v408_v44  ;;  %v531_v53 = vpop.f32.mrb[6].mxu0  ;;  %v571_v54 = vpop.f32.mrb[6].mxu1 }
 0x112   : > { %v600_v55 = vmax.f32 %v528_v47, 0.0  ;;  %v616_v56 = vmax.f32 %v568_v48, 0.0  ;;  %v532_v57 = vadd.f32 %v531_v53, %v373_v12  ;;  %v572_v58 = vadd.f32 %v571_v54, %v413_v43  ;;  %v533_v59 = vpop.f32.mrb[7].mxu0  ;;  %v573_v60 = vpop.f32.mrb[7].mxu1 }
 0x113   : > { %v601_v61 = vmax.f32 %v530_v51, 0.0  ;;  %v617_v62 = vmax.f32 %v570_v52, 0.0  ;;  %v534_v63 = vadd.f32 %v533_v59, %v373_v12  ;;  %v574_v1 = vadd.f32 %v573_v60, %v413_v43 }
 0x114   : > { %632 = vst [vmem:[%s1073_s26 + $0x20] sm:$0xff] %v600_v55  ;;  %648 = vst [vmem:[%s1073_s26 + $0xa0] sm:$0xff] %v616_v56  ;;  %v602_v2 = vmax.f32 %v532_v57, 0.0  ;;  %v618_v3 = vmax.f32 %v572_v58, 0.0 }
 0x115   : > { %633 = vst [vmem:[%s1073_s26 + $0x28] sm:$0xff] %v601_v61  ;;  %649 = vst [vmem:[%s1073_s26 + $0xa8] sm:$0xff] %v617_v62  ;;  %v603_v4 = vmax.f32 %v534_v63, 0.0  ;;  %v619_v5 = vmax.f32 %v574_v1, 0.0 }
 0x116   : > { %634 = vst [vmem:[%s1073_s26 + $0x30] sm:$0xff] %v602_v2  ;;  %650 = vst [vmem:[%s1073_s26 + $0xb0] sm:$0xff] %v618_v3 }
 0x117   : > { %635 = vst [vmem:[%s1073_s26 + $0x38] sm:$0xff] %v603_v4  ;;  %651 = vst [vmem:[%s1073_s26 + $0xb8] sm:$0xff] %v619_v5  ;;  %v537_v8 = vpop.f32.mrb[8].mxu0  ;;  %v577_v9 = vpop.f32.mrb[8].mxu1 }
 0x118   : > { %v538_v10 = vadd.f32 %v537_v8, %v1062_v15  ;;  %v578_v11 = vadd.f32 %v577_v9, %v418_v7  ;;  %v539_v12 = vpop.f32.mrb[9].mxu0  ;;  %v579_v13 = vpop.f32.mrb[9].mxu1 }
 0x119   : > { %v540_v17 = vadd.f32 %v539_v12, %v1062_v15  ;;  %v580_v18 = vadd.f32 %v579_v13, %v418_v7  ;;  %v541_v19 = vpop.f32.mrb[10].mxu0  ;;  %v581_v20 = vpop.f32.mrb[10].mxu1 }
 0x11a   : > { %v604_v21 = vmax.f32 %v538_v10, 0.0  ;;  %v620_v22 = vmax.f32 %v578_v11, 0.0  ;;  %v542_v23 = vadd.f32 %v541_v19, %v1060_v14  ;;  %v582_v24 = vadd.f32 %v581_v20, %v423_v6  ;;  %v543_v25 = vpop.f32.mrb[11].mxu0  ;;  %v583_v26 = vpop.f32.mrb[11].mxu1 }
 0x11b   : > { %v605_v27 = vmax.f32 %v540_v17, 0.0  ;;  %v621_v28 = vmax.f32 %v580_v18, 0.0  ;;  %v544_v15 = vadd.f32 %v543_v25, %v1060_v14  ;;  %v584_v29 = vadd.f32 %v583_v26, %v423_v6 }
 0x11c   : > { %636 = vst [vmem:[%s1073_s26 + $0x40] sm:$0xff] %v604_v21  ;;  %652 = vst [vmem:[%s1073_s26 + $0xc0] sm:$0xff] %v620_v22  ;;  %v606_v30 = vmax.f32 %v542_v23, 0.0  ;;  %v622_v31 = vmax.f32 %v582_v24, 0.0 }
 0x11d   : > { %637 = vst [vmem:[%s1073_s26 + $0x48] sm:$0xff] %v605_v27  ;;  %653 = vst [vmem:[%s1073_s26 + $0xc8] sm:$0xff] %v621_v28  ;;  %v607_v32 = vmax.f32 %v544_v15, 0.0  ;;  %v623_v33 = vmax.f32 %v584_v29, 0.0 }
 0x11e   : > { %638 = vst [vmem:[%s1073_s26 + $0x50] sm:$0xff] %v606_v30  ;;  %654 = vst [vmem:[%s1073_s26 + $0xd0] sm:$0xff] %v622_v31 }
 0x11f   : > { %639 = vst [vmem:[%s1073_s26 + $0x58] sm:$0xff] %v607_v32  ;;  %655 = vst [vmem:[%s1073_s26 + $0xd8] sm:$0xff] %v623_v33  ;;  %v547_v36 = vpop.f32.mrb[12].mxu0  ;;  %v587_v37 = vpop.f32.mrb[12].mxu1 }
 0x120   : > { %v548_v38 = vadd.f32 %v547_v36, %v1066_v16  ;;  %v588_v14 = vadd.f32 %v587_v37, %v428_v35  ;;  %v549_v39 = vpop.f32.mrb[13].mxu0  ;;  %v589_v40 = vpop.f32.mrb[13].mxu1 }
 0x121   : > { %v550_v41 = vadd.f32 %v549_v39, %v1066_v16  ;;  %v590_v42 = vadd.f32 %v589_v40, %v428_v35  ;;  %v551_v43 = vpop.f32.mrb[14].mxu0  ;;  %v591_v44 = vpop.f32.mrb[14].mxu1 }
 0x122   : > { %v608_v45 = vmax.f32 %v548_v38, 0.0  ;;  %v624_v46 = vmax.f32 %v588_v14, 0.0  ;;  %v552_v47 = vadd.f32 %v551_v43, %v1064_v0  ;;  %v592_v48 = vadd.f32 %v591_v44, %v433_v34  ;;  %v553_v49 = vpop.f32.mrb[15].mxu0  ;;  %v593_v50 = vpop.f32.mrb[15].mxu1 }
 0x123   : > { %v609_v51 = vmax.f32 %v550_v41, 0.0  ;;  %v625_v52 = vmax.f32 %v590_v42, 0.0  ;;  %v554_v16 = vadd.f32 %v553_v49, %v1064_v0  ;;  %v594_v53 = vadd.f32 %v593_v50, %v433_v34 }
 0x124   : > { %640 = vst [vmem:[%s1073_s26 + $0x60] sm:$0xff] %v608_v45  ;;  %656 = vst [vmem:[%s1073_s26 + $0xe0] sm:$0xff] %v624_v46  ;;  %v610_v54 = vmax.f32 %v552_v47, 0.0  ;;  %v626_v55 = vmax.f32 %v592_v48, 0.0 }
 0x125   : > { %641 = vst [vmem:[%s1073_s26 + $0x68] sm:$0xff] %v609_v51  ;;  %657 = vst [vmem:[%s1073_s26 + $0xe8] sm:$0xff] %v625_v52  ;;  %v611_v56 = vmax.f32 %v554_v16, 0.0  ;;  %v627_v57 = vmax.f32 %v594_v53, 0.0 }
 0x126   : > { %642 = vst [vmem:[%s1073_s26 + $0x70] sm:$0xff] %v610_v54  ;;  %658 = vst [vmem:[%s1073_s26 + $0xf0] sm:$0xff] %v626_v55 }
 0x127   : > { %643 = vst [vmem:[%s1073_s26 + $0x78] sm:$0xff] %v611_v56  ;;  %659 = vst [vmem:[%s1073_s26 + $0xf8] sm:$0xff] %v627_v57 }
 0x128 PF: > { %s13_s14 = sadd.s32 1, %s895_s14   ;;  %s1128_s12 = smov %s891_s13 }
 0x129   : > { %p10_p5 = scmp.ge.s32.totalorder %s13_s14, 4   ;;  %s1129_s13 = smov %s1131_s15 }
 0x12b   :  { %12 = sbr.rel (!%p10_p5) target bundleno = 2 (0x2), region = 68 }

</bundles_post_ra>
